<compile_context>
chip_gen: v5e
topology: v5e:2x2
jax: 0.10.0
libtpu: 0.0.40
codegen_flags: <defaults>
</compile_context>

<pallas_src>
import functools

import jax
import jax.numpy as jnp
from jax.experimental import pallas as pl
from jax.experimental.pallas import tpu as pltpu


def _round_up(x, m):
    return ((x + m - 1) // m) * m


def _tpu_defaults():
    """Generation-aware (tm_target, tn_target, vmem_budget_bytes).

    tm targets come from the W-stream roofline (flops/byte needed to be
    MXU-bound): v5e ~240, v6e ~680, v7x ~310.  VMEM budgets leave headroom
    under each chip's physical VMEM (128 MiB on v5e/v6e, 64 MiB on v7x).
    """
    kind = ""
    try:
        kind = jax.devices()[0].device_kind.lower()
    except Exception:
        pass
    if "v5" in kind:
        return 256, 1024, 100 << 20
    if "v6" in kind:
        return 1024, 1024, 100 << 20
    if "v7" in kind:
        return 512, 1024, 48 << 20
    return 512, 1024, 48 << 20  # unknown chip: conservative VMEM cap


def _rmsnorm_lmhead_kernel(g_ref, x_ref, w_ref, o_ref, hn_ref, *, eps):
    # g_ref : [1,  H] f32   RMSNorm gamma (folded into x here, not into W)
    # x_ref : [tm, H] bf16  hidden states for one token tile
    # w_ref : [H, tn] bf16  lm_head weight tile
    # o_ref : [tm,tn]       logits tile
    # hn_ref: [tm, H] bf16  VMEM scratch: normalized activations (persists
    #                       across the vocab grid axis)
    @pl.when(pl.program_id(1) == 0)
    def _():
        # RMSNorm in f32, once per token tile (vocab axis is "arbitrary",
        # iterated innermost per token tile, so j==0 always runs first).
        x = x_ref[...].astype(jnp.float32)
        var = jnp.mean(x * x, axis=-1, keepdims=True)     # full-H reduce
        inv = jax.lax.rsqrt(var + eps)
        g = g_ref[...].astype(jnp.float32)
        hn_ref[...] = (x * inv * g).astype(jnp.bfloat16)

    o_ref[...] = jnp.dot(
        hn_ref[...], w_ref[...], preferred_element_type=jnp.float32
    ).astype(o_ref.dtype)


def logits_forward(input_ids, embed_table, gamma, w_lm, *,
                   eps=1e-6, tm_max=None, tn_max=None,
                   out_dtype=jnp.bfloat16):
    """Equivalent of LogitsWrapper(model)(input_ids) -> logits [B, S, V]."""
    B, S = input_ids.shape
    _, H = embed_table.shape
    H2, V = w_lm.shape
    assert H == H2
    T = B * S

    # --- Glue: embedding gather (data-dependent row lookup) in plain JAX.
    # TODO(synk): fuse via scalar-prefetched input_ids + per-row DMA.
    h = jnp.take(embed_table, input_ids.reshape(-1), axis=0)      # [T, H]
    h = h.astype(jnp.bfloat16)            # stream activations as bf16

    # lm_head streams as bf16.  Callers should pre-quantize W once outside
    # the forward path (then this is a no-op: no per-call HBM rewrite of W).
    w = w_lm if w_lm.dtype == jnp.bfloat16 else w_lm.astype(jnp.bfloat16)
    g = gamma.reshape(1, H).astype(jnp.float32)

    # --- Tile selection: MXU-sized token tile, lane-dense vocab tile.
    tm_t, tn_t, vmem_budget = _tpu_defaults()
    if tm_max is not None:
        tm_t = min(tm_t, tm_max)
    if tn_max is not None:
        tn_t = min(tn_t, tn_max)
    tm = max(8, min(tm_t, _round_up(T, 16)))      # >=16 except tiny overrides
    tn = max(128, min(tn_t, _round_up(V, 128)))   # multiple of 128 lanes

    # Pad T / V up to tile multiples (unmasked stores, no oversized blocks);
    # padded rows are zero -> RMSNorm gives 0 -> logits 0 -> sliced off.
    T_pad = _round_up(T, tm)
    V_pad = _round_up(V, tn)
    if T_pad != T:
        h = jnp.pad(h, ((0, T_pad - T), (0, 0)))
    if V_pad != V:
        w = jnp.pad(w, ((0, 0), (0, V_pad - V)))
    grid = (T_pad // tm, V_pad // tn)

    # VMEM: double-buffered h/W/out tiles + hn scratch + gamma, with headroom,
    # capped by the generation-aware budget.
    out_isz = jnp.dtype(out_dtype).itemsize
    need = (2 * (tm * H * 2 + H * tn * 2 + tm * tn * out_isz)
            + tm * H * 2 + 8 * _round_up(H, 128) * 4)
    vmem_limit = max(16 << 20, min(int(need * 3 // 2) + (4 << 20), vmem_budget))

    kernel = functools.partial(_rmsnorm_lmhead_kernel, eps=eps)
    out = pl.pallas_call(
        kernel,
        out_shape=jax.ShapeDtypeStruct((T_pad, V_pad), out_dtype),
        grid_spec=pltpu.PrefetchScalarGridSpec(
            num_scalar_prefetch=0,
            grid=grid,
            in_specs=[
                pl.BlockSpec((1, H), lambda i, j: (0, 0)),    # gamma
                pl.BlockSpec((tm, H), lambda i, j: (i, 0)),   # hidden (bf16)
                pl.BlockSpec((H, tn), lambda i, j: (0, j)),   # lm_head (bf16)
            ],
            out_specs=pl.BlockSpec((tm, tn), lambda i, j: (i, j)),
            scratch_shapes=[pltpu.VMEM((tm, H), jnp.bfloat16)],
        ),
        compiler_params=pltpu.CompilerParams(
            # Token axis parallel (megacore sharding); vocab axis must be
            # "arbitrary" so the per-token-tile RMSNorm hoist is valid.
            dimension_semantics=("parallel", "arbitrary"),
            vmem_limit_bytes=vmem_limit),
    )(g, h, w)

    return out[:T, :V].reshape(B, S, V)


if __name__ == "__main__":
    # Small, deterministic synthetic "model" parameters.
    B, S = 2, 16         # batch, sequence  -> T = 32 tokens
    H = 128              # hidden size (lane-aligned)
    V = 512              # vocab size (multiple of 128 -> lane-dense logits)

    key = jax.random.PRNGKey(0)
    k_ids, k_emb, k_g, k_w = jax.random.split(key, 4)

    input_ids = jax.random.randint(k_ids, (B, S), 0, V, dtype=jnp.int32)
    embed_table = (jax.random.normal(k_emb, (V, H), dtype=jnp.float32)
                   * (1.0 / jnp.sqrt(H)))
    gamma = 1.0 + 0.1 * jax.random.normal(k_g, (1, H), dtype=jnp.float32)
    w_lm_f32 = (jax.random.normal(k_w, (H, V), dtype=jnp.float32)
                * (1.0 / jnp.sqrt(H)))
    # Pre-quantize the lm_head ONCE outside the forward path (no per-call
    # gamma-fold / bf16 re-materialization of the full [H, V] weight in HBM).
    w_lm_bf16 = w_lm_f32.astype(jnp.bfloat16)

    # Small tile caps so the demo exercises a real 2x2 (token x vocab) grid
    # and the hoisted per-token-tile RMSNorm.
    logits = logits_forward(input_ids, embed_table, gamma, w_lm_bf16,
                            tm_max=16, tn_max=256)
    logits = jax.block_until_ready(logits)

    # Pure-JAX f32 reference (loose tolerance: bf16 activations/weights/out).
    h_ref = jnp.take(embed_table, input_ids.reshape(-1), axis=0)
    inv = jax.lax.rsqrt(jnp.mean(h_ref * h_ref, axis=-1, keepdims=True) + 1e-6)
    ref = ((h_ref * inv * gamma) @ w_lm_f32).reshape(B, S, V)

    assert logits.shape == (B, S, V)
    assert jnp.allclose(logits.astype(jnp.float32), ref, atol=5e-2, rtol=5e-2)

    print("KERNEL_OK")
</pallas_src>

<mosaic_0001>
module attributes {stable_mosaic.version = 11 : i64} {
  func.func @_rmsnorm_lmhead_kernel(%arg0: i32, %arg1: i32, %arg2: memref<1x128xf32, #tpu.memory_space<vmem>>, %arg3: memref<16x128xbf16, #tpu.memory_space<vmem>>, %arg4: memref<128x256xbf16, #tpu.memory_space<vmem>>, %arg5: memref<16x256xbf16, #tpu.memory_space<vmem>>, %arg6: memref<16x128xbf16, #tpu.memory_space<vmem>>) attributes {dimension_semantics = [#tpu.dimension_semantics<parallel>, #tpu.dimension_semantics<arbitrary>], iteration_bounds = array<i64: 2, 2>, scalar_prefetch = 0 : i64, scratch_operands = 1 : i64, tpu.core_type = #tpu.core_type<tc>, window_params = [{pipeline_mode = #tpu.pipeline_mode<synchronous>, transform_indices = @transform_0, window_bounds = array<i64: 1, 128>}, {transform_indices = @transform_1, window_bounds = array<i64: 16, 128>}, {transform_indices = @transform_2, window_bounds = array<i64: 128, 256>}, {transform_indices = @transform_3, window_bounds = array<i64: 16, 256>}]} {
    %c0_i32 = arith.constant 0 : i32
    %0 = arith.cmpi eq, %arg1, %c0_i32 : i32
    %1 = arith.extui %0 : i1 to i32
    %c0_i32_0 = arith.constant 0 : i32
    %2 = arith.cmpi ne, %1, %c0_i32_0 : i32
    scf.if %2 {
      %c0_6 = arith.constant 0 : index
      %c0_7 = arith.constant 0 : index
      %8 = vector.load %arg3[%c0_6, %c0_7] : memref<16x128xbf16, #tpu.memory_space<vmem>>, vector<16x128xbf16>
      %9 = arith.extf %8 : vector<16x128xbf16> to vector<16x128xf32>
      %10 = arith.mulf %9, %9 : vector<16x128xf32>
      %cst_8 = arith.constant dense<0.000000e+00> : vector<16xf32>
      %11 = vector.multi_reduction <add>, %10, %cst_8 [1] : vector<16x128xf32> to vector<16xf32>
      %12 = vector.shape_cast %11 : vector<16xf32> to vector<16x1xf32>
      %cst_9 = arith.constant 1.280000e+02 : f32
      %13 = vector.broadcast %cst_9 : f32 to vector<16x1xf32>
      %14 = arith.divf %12, %13 : vector<16x1xf32>
      %cst_10 = arith.constant 9.99999997E-7 : f32
      %15 = vector.broadcast %cst_10 : f32 to vector<16x1xf32>
      %16 = arith.addf %14, %15 : vector<16x1xf32>
      %17 = math.rsqrt %16 : vector<16x1xf32>
      %c0_11 = arith.constant 0 : index
      %c0_12 = arith.constant 0 : index
      %18 = vector.load %arg2[%c0_11, %c0_12] : memref<1x128xf32, #tpu.memory_space<vmem>>, vector<1x128xf32>
      %19 = vector.broadcast %17 : vector<16x1xf32> to vector<16x128xf32>
      %20 = arith.mulf %9, %19 : vector<16x128xf32>
      %21 = vector.broadcast %18 : vector<1x128xf32> to vector<16x128xf32>
      %22 = arith.mulf %20, %21 : vector<16x128xf32>
      %23 = arith.truncf %22 : vector<16x128xf32> to vector<16x128xbf16>
      %c0_13 = arith.constant 0 : index
      %c0_14 = arith.constant 0 : index
      %24 = vector.load %arg6[%c0_13, %c0_14] : memref<16x128xbf16, #tpu.memory_space<vmem>>, vector<16x128xbf16>
      tpu.vector_store %arg6[%c0_13, %c0_14], %23 {strides = array<i32>} : memref<16x128xbf16, #tpu.memory_space<vmem>>, vector<16x128xbf16>,
    } else {
    }
    %c0 = arith.constant 0 : index
    %c0_1 = arith.constant 0 : index
    %3 = vector.load %arg6[%c0, %c0_1] : memref<16x128xbf16, #tpu.memory_space<vmem>>, vector<16x128xbf16>
    %c0_2 = arith.constant 0 : index
    %c0_3 = arith.constant 0 : index
    %4 = vector.load %arg4[%c0_2, %c0_3] : memref<128x256xbf16, #tpu.memory_space<vmem>>, vector<128x256xbf16>
    %cst = arith.constant dense<0.000000e+00> : vector<16x256xf32>
    %5 = tpu.matmul %3, %4, %cst {dimension_numbers = #tpu.dot_dimension_numbers<[1], [0], [0], [1], [0, 0, 1, 1], [], []>} : vector<16x128xbf16>, vector<128x256xbf16>, vector<16x256xf32> -> vector<16x256xf32>
    %6 = arith.truncf %5 : vector<16x256xf32> to vector<16x256xbf16>
    %c0_4 = arith.constant 0 : index
    %c0_5 = arith.constant 0 : index
    %7 = vector.load %arg5[%c0_4, %c0_5] : memref<16x256xbf16, #tpu.memory_space<vmem>>, vector<16x256xbf16>
    tpu.vector_store %arg5[%c0_4, %c0_5], %6 {strides = array<i32>} : memref<16x256xbf16, #tpu.memory_space<vmem>>, vector<16x256xbf16>,
    return
  }
  func.func @transform_0(%arg0: i32, %arg1: i32) -> (i32, i32) {
    %c0_i32 = arith.constant 0 : i32
    %c0_i32_0 = arith.constant 0 : i32
    %c0_i32_1 = arith.constant 0 : i32
    return %c0_i32, %c0_i32_0 : i32, i32
  }
  func.func @transform_1(%arg0: i32, %arg1: i32) -> (i32, i32) {
    %c0_i32 = arith.constant 0 : i32
    %c0_i32_0 = arith.constant 0 : i32
    return %arg0, %c0_i32 : i32, i32
  }
  func.func @transform_2(%arg0: i32, %arg1: i32) -> (i32, i32) {
    %c0_i32 = arith.constant 0 : i32
    %c0_i32_0 = arith.constant 0 : i32
    return %c0_i32, %arg1 : i32, i32
  }
  func.func @transform_3(%arg0: i32, %arg1: i32) -> (i32, i32) {
    %c0_i32 = arith.constant 0 : i32
    return %arg0, %arg1 : i32, i32
  }
}

</mosaic_0001>

<bundles_post_ra>
// kernel: tpu_custom_call.1
= control target key start
LH: loop header
LB: loop body
LE: loop exit
PB: predicated region body
PF: predicated region fallthrough
CT: control target
= control target key end

     0   :  { %s1477_s0 = inlined_call_operand.hbm [shape: f32[1,128], index: 0, kind: input, shape index: {}]   ;;  %s1478_s1 = inlined_call_operand.hbm [shape: bf16[32,128], index: 1, kind: input, shape index: {}]   ;;  %s1479_s2 = inlined_call_operand.hbm [shape: bf16[128,512], index: 2, kind: input, shape index: {}]   ;;  %s1480_s3 = inlined_call_operand.hbm [shape: bf16[32,512], index: 3, kind: output, shape index: {}]  }
   0x1   :  { %1488 = sst [smem:[#allocation23_spill]] %s1477_s0 }
   0x2   :  { %1489 = sst [smem:[#allocation24_spill]] %s1478_s1 }
   0x3   :  { %1490 = sst [smem:[#allocation25_spill]] %s1480_s3 }
   0x4   :  { %8 = vsyncpa [#allocation4], 0 }
   0x5   :  { %9 = vsyncpa [#allocation7], 0 }
   0x6   :  { %11 = vsyncpa [#allocation7 + $0x1], 0 }
   0x7   :  { %12 = vsyncpa [#allocation5], 0 }
   0x8   :  { %14 = vsyncpa [#allocation5 + $0x1], 0  ;;  %s1149_s12 = smov 0   ;;  %s1151_s13 = smov 0  }
   0x9   :  { %s1153_s14 = smov 0   ;;  %s1155_s15 = smov 0  }
   0xa   :  { %s1157_s16 = smov 0   ;;  %s1159_s17 = smov 0  }
   0xb   :  { %s1161_s18 = smov 0   ;;  %s1163_s19 = smov 0  }
   0xc   :  { %s1165_s20 = smov 0   ;;  %s1167_s21 = smov 0  }
   0xd   :  { %s1169_s22 = smov 0   ;;  %s1171_s23 = smov 0  }
   0xe   :  { %s1173_s24 = smov 0   ;;  %s1175_s25 = smov 0  }
   0xf LB: > { %1491 = sst [smem:[#allocation14_spill]] %s1073_s14  ;;  %s29_s26 = sadd.s32 1, %s1109_s23  ;;  %s1117_s25 = sphi %s1175_s25, %s20_s25   ;;  %s1113_s24 = sphi %s1173_s24, %s1522_s24   ;;  %s1109_s23 = sphi %s1171_s23, %s1531_s23   ;;  %s1105_s22 = sphi %s1169_s22, %s1520_s22   ;;  %s1101_s21 = sphi %s1167_s21, %s1530_s21   ;;  %s1097_s20 = sphi %s1165_s20, %s1519_s20   ;;  %s1093_s19 = sphi %s1163_s19, %s1529_s19   ;;  %s1089_s18 = sphi %s1161_s18, %s1528_s18   ;;  %s1085_s17 = sphi %s1159_s17, %s1527_s17   ;;  %s1081_s16 = sphi %s1157_s16, %s1526_s16   ;;  %s1077_s15 = sphi %s1155_s15, %s1525_s15   ;;  %s1073_s14 = sphi %s1153_s14, %s1516_s14   ;;  %s1069_s13 = sphi %s1151_s13, %s1524_s13   ;;  %s1065_s12 = sphi %s1149_s12, %s1523_s12  }
  0x10   : > { %1492 = sst [smem:[#allocation15_spill]] %s1097_s20  ;;  %s32_s27 = sadd.s32 1, %s1113_s24 }
  0x11   : > { %1493 = sst [smem:[#allocation16_spill]] %s1105_s22  ;;  %p30_p0 = scmp.ge.s32.totalorder %s29_s26, 2 }
  0x12   : > { %1494 = sst [smem:[#allocation17_spill]] %s1113_s24  ;;  %s60_s28 = sadd.s32 1, %s1097_s20 }
  0x13   : > { %p67_p1 = scmp.ne.s32.totalorder %s1097_s20, %s1093_s19  ;;  %p68_p2 = scmp.eq.s32.totalorder %s1117_s25, 0 }
  0x14   : > { %s1533_s26 = smov (%p30_p0, %s29_s26), 0  ;;  %s1535_s27 = smov (!%p30_p0, %s32_s27), %s1113_s24 }
  0x15   : > { %1495 = sst [smem:[#allocation18_spill]] %s1533_s26  ;;  %p1230_p3 = por %p68_p2, %p67_p1 }
  0x16   : > { %s1236_s30 = ssub.s32 %s1109_s23, %s1533_s26  ;;  %p34_p4 = scmp.ge.s32.totalorder %s1535_s27, 2 }
  0x17   : > { %p84_p5 = scmp.eq.s32.totalorder %s1236_s30, 0  ;;  %p1484_p6 = scmp.lt.s32.totalorder %s1117_s25, 4 }
  0x18   : > { %s1537_s27 = smov (%p34_p4, %s1535_s27), 0  ;;  %s163_s4 = sand.u32 1, %s1117_s25  }
  0x19   : > { %1497 = sst [smem:[#allocation19_spill]] %s1537_s27  ;;  %s165_s5 = sand.u32 1, %s1097_s20  }
  0x1a   : > { %s57_s6 = ssub.s32 %s1113_s24, %s1537_s27  ;;  %s599_s9 = sshll.u32 %s165_s5, 3 }
  0x1b   : > { %p58_p7 = scmp.eq.s32.totalorder %s57_s6, 0  ;;  %s111_s7 = sor.u32 %s1236_s30, %s57_s6 }
  0x1c   : > { %p1247_p8 = scmp.eq.s32.totalorder %s111_s7, 0  ;;  %s686_s11 = sshll.u32 %s1113_s24, 3 }
  0x1d   : > { %s1252_s10 = scalar_select %p58_p7, %s1097_s20, %s60_s28  }
  0x1e   : > { %s1500_s1 = sld [smem:[#allocation24_spill]]  ;;  %s167_s6 = scalar_lea.vmem [#allocation6], %s599_s9 }
  0x1f   : > { %1499 = sst [smem:[#allocation20_spill]] %s1252_s10  ;;  %s175_s27 = sshll.u32 %s167_s6, 4  ;;  %s176_s27 = int_to_ptr.vmem [resolvable:$true] %s175_s27 }
  0x20   : > { %p730_p9 = pnand %p1484_p6, %p1230_p3  ;;  %s1262_s3 = scalar_lea.sflag [#allocation7], %s163_s4 }
  0x21   : > { %s1119_s26 = smov 64   ;;  %s1120_s28 = smov 4  }
  0x22   : > { %s595_s29 = sadd.s32 4294967294, %s1117_s25   ;;  %p73_p10 = scmp.ne.s32.totalorder %s1093_s19, %s1089_s18 }
  0x23   : > { %s86_s4 = sadd.s32 1, %s1085_s17  ;;  %p93_p13 = scmp.ne.s32.totalorder %s1085_s17, %s1081_s16 }
  0x24   : > { %s172_s22 = scalar_lea.hbm %s1500_s1, %s686_s11  ;;  %p99_p0 = scmp.ne.s32.totalorder %s1081_s16, %s1077_s15 }
  0x25   : > { %s173_s7 = sshll.u32 %s172_s22, 4  ;;  %s1266_s22 = sadd.s32 4294967295, %s1117_s25   ;;  %s174_s7 = int_to_ptr.hbm [resolvable:$true] %s173_s7 }
  0x26   : > { %732 = dma.hbm_to_vmem [thread:$0]  (!%p730_p9), %s174_s7, 128, %s176_s27, %s1262_s3, %s1119_s26, %s1119_s26, %s1120_s28  }
  0x27   : > { %p74_p11 = scmp.eq.s32.totalorder %s1266_s22, 0  ;;  %s114_s9 = sadd.s32 1, %s1073_s14 }
  0x28   : > { %s1276_s5 = scalar_select %p84_p5, %s1085_s17, %s86_s4  }
  0x29   : > { %p1280_p12 = por %p74_p11, %p73_p10  ;;  %p1291_p1 = por %p93_p13, %p68_p2 }
  0x2a   : > { %1501 = sst [smem:[#allocation21_spill]] %s1276_s5  ;;  %p124_p3 = scmp.ne.s32.totalorder %s1073_s14, %s1069_s13 }
  0x2b   : > { %p1299_p4 = por %p99_p0, %p74_p11  ;;  %p125_p5 = scmp.eq.s32.totalorder %s1266_s22, 3 }
  0x2c   : > { %s1307_s30 = scalar_select %p1247_p8, %s1073_s14, %s114_s9  }
  0x2d   : > { %p1309_p7 = por %p125_p5, %p124_p3  ;;  %p130_p2 = scmp.ne.s32.totalorder %s1069_s13, %s1065_s12 }
  0x2e   : > { %1505 = sst [smem:[#allocation22_spill]] %s1307_s30  ;;  %p131_p9 = scmp.eq.s32.totalorder %s595_s29, 3 }
  0x2f   : > { %p596_p10 = scmp.ge.s32.totalorder %s1117_s25, 1  ;;  %p138_p13 = scmp.lt.s32.totalorder %s1117_s25, 5 }
  0x30   : > { %p1317_p6 = por %p131_p9, %p130_p2  ;;  %s1508_s0 = sld [smem:[#allocation23_spill]] }
  0x31   : > { %p1324_p8 = pnand %p596_p10, %p138_p13  ;;  %p1510_p0 = scmp.lt.s32.totalorder %s1117_s25, 4 }
  0x32   : > { %s1121_s4 = smov [#allocation3]   ;;  %s187_s7 = sand.u32 1, %s1085_s17  }
  0x33   : > { %p1332_p3 = pnand %p1510_p0, %p1291_p1  ;;  %p725_p5 = pneg %p1324_p8 }
  0x34   : > { %s152_s9 = sshll.u32 %s1121_s4, 4  ;;  %s602_s26 = sshll.u32 %s187_s7, 7  ;;  %s153_s9 = int_to_ptr.vmem [resolvable:$true] %s152_s9 }
  0x35   : > { %p726_p2 = pnand %p725_p5, %p74_p11  ;;  %s189_s10 = scalar_lea.vmem [#allocation8], %s602_s26 }
  0x36   : > { %s150_s8 = sshll.u32 %s1508_s0, 4  ;;  %s687_s0 = sshll.u32 %s1109_s23, 3  ;;  %s151_s8 = int_to_ptr.hbm [resolvable:$true] %s150_s8 }
  0x37   : > { %728 = dma.hbm_to_vmem [thread:$0]  (!%p726_p2), %s151_s8, 16, %s153_s9, [#allocation4]  }
  0x38   : > { %s194_s24 = scalar_lea.hbm %s1479_s2, %s687_s0  ;;  %s197_s20 = sshll.u32 %s189_s10, 4  ;;  %s198_s20 = int_to_ptr.vmem [resolvable:$true] %s197_s20 }
  0x39   : > { %s195_s5 = sshll.u32 %s194_s24, 4  ;;  %s1122_s30 = smov 256   ;;  %s196_s5 = int_to_ptr.hbm [resolvable:$true] %s195_s5 }
  0x3a   : > { %s1123_s4 = smov 128   ;;  %s1124_s14 = smov 8  }
  0x3b   : > { %735 = dma.hbm_to_vmem [thread:$0]  (!%p1332_p3), %s196_s5, 2048, %s198_s20, %s1262_s3, %s1122_s30, %s1123_s4, %s1124_s14  }
  0x3c   : > { %209 = sbr.rel (%p1324_p8) target bundleno = 415 (0x19f), region = 32 }
  0x41   : > { %1048 = dma.done.wait (%p74_p11), [#allocation4], 16  }
  0x42   : > { %1050 = vsyncadd (%p74_p11), [#allocation4], 4294967280  ;;  %s216_s0 = sand.u32 1, %s1266_s22   ;;  %s218_s1 = sand.u32 1, %s1093_s19  }
  0x43   : > { %s607_s24 = sshll.u32 %s218_s1, 3  ;;  %s217_s10 = scalar_lea.sflag [#allocation7], %s216_s0 }
  0x44   : > { %s220_s8 = scalar_lea.vmem [#allocation6], %s607_s24 }
  0x45   : > { %1052 = dma.done.wait (%p1280_p12), %s217_s10, 128  }
  0x46   : > { %1054 = vsyncadd (%p1280_p12), %s217_s10, 4294967168  ;;  %s228_s14 = sand.u32 1, %s1081_s16  }
  0x47   : > { %s608_s20 = sshll.u32 %s228_s14, 7 }
  0x48   : > { %s1361_s3 = scalar_lea.vmem [#allocation8], %s608_s20 }
  0x49   : > { %1056 = dma.done.wait (%p1299_p4), %s217_s10, 2048  }
  0x4a   : > { %1058 = vsyncadd (%p1299_p4), %s217_s10, 4294965248  ;;  %s256_s22 = sand.u32 1, %s1069_s13   ;;  %p610_p11 = scmp.ne.s32.totalorder %s1101_s21, 0 }
  0x4b   : > { %s609_s5 = sshll.u32 %s256_s22, 4 }
  0x4c   : > { %s1370_s30 = scalar_lea.vmem [#allocation9], %s609_s5  ;;  %266 = sbr.rel (%p610_p11) target bundleno = 239 (0xef), region = 48 }
  0x51   : > { %v707_v0 = vld [vmem:[%s220_s8] sm:$0xff]   ;;  %v1125_v5 = vmov 128.0   ;;  %v866_v31 = vld [vmem:[#allocation3] ss:$0 sm:$0xff] }
  0x52   : > { %v708_v1 = vunpack.c.l.bf16 %v707_v0  ;;  %v709_v3 = vunpack.c.h.bf16 %v707_v0  ;;  %867 = vrcp.f32 %v1125_v5 }
  0x54   : > { %v271_v2 = vmul.f32 %v708_v1, %v708_v1  ;;  %v272_v4 = vmul.f32 %v709_v3, %v709_v3 }
  0x56   : > { %273 = vadd.xlane.f32.xlu0 %v271_v2 }
  0x58   : > { %v868_v6 = vpop.eup %867 }
  0x59   : > { %v278_v7 = vmul.f32 128.0, %v868_v6  ;;  %vm282_vm0 = vweird.f32 %v868_v6 }
  0x5b   : > { %v279_v8 = vsub.f32 1.0, %v278_v7 }
  0x5d   : > { %v280_v9 = vmul.f32 %v868_v6, %v279_v8 }
  0x5e   : > { %275 = vadd.xlane.f32.xlu0 %v272_v4 }
  0x5f   : > { %v281_v10 = vadd.f32 %v868_v6, %v280_v9 }
  0x61   : > { %v283_v11 = vsel %vm282_vm0, %v868_v6, %v281_v10 }
  0xc9   : > { %v274_v12 = vpop.xlane.xlu0 %273 }
  0xca   : > { %v284_v13 = vmul.f32 %v283_v11, %v274_v12 }
  0xcc   : > { %v286_v14 = vadd.f32 1e-06, %v284_v13 }
  0xce   : > { %869 = vrsqrt.f32 %v286_v14  ;;  %vm294_vm2 = vweird.f32 %v286_v14 }
  0xd1   : > { %v276_v15 = vpop.xlane.xlu0 %275 }
  0xd2   : > { %v285_v16 = vmul.f32 %v283_v11, %v276_v15 }
  0xd4   : > { %v870_v17 = vpop.eup %869  ;;  %v287_v18 = vadd.f32 1e-06, %v285_v16 }
  0xd5   : > { %v289_v19 = vmul.f32 %v870_v17, %v286_v14  ;;  %vm295_vm1 = vweird.f32 %v870_v17 }
  0xd6   : > { %871 = vrsqrt.f32 %v287_v18  ;;  %vm296_vm3 = vmor %vm294_vm2, %vm295_vm1  ;;  %vm304_vm5 = vweird.f32 %v287_v18 }
  0xd7   : > { %v290_v20 = vmul.f32 %v870_v17, %v289_v19 }
  0xd9   : > { %v291_v21 = vmul.f32 0.5, %v290_v20 }
  0xdb   : > { %v292_v22 = vsub.f32 1.5, %v291_v21 }
  0xdc   : > { %v872_v23 = vpop.eup %871 }
  0xdd   : > { %v299_v24 = vmul.f32 %v872_v23, %v287_v18  ;;  %v293_v25 = vmul.f32 %v870_v17, %v292_v22  ;;  %vm305_vm4 = vweird.f32 %v872_v23 }
  0xde   : > { %vm306_vm6 = vmor %vm304_vm5, %vm305_vm4 }
  0xdf   : > { %v300_v26 = vmul.f32 %v872_v23, %v299_v24  ;;  %v297_v28 = vsel %vm296_vm3, %v870_v17, %v293_v25 }
  0xe0   : > { %v309_v32 = vmul.f32 %v708_v1, %v297_v28 }
  0xe1   : > { %v301_v27 = vmul.f32 0.5, %v300_v26 }
  0xe2   : > { %v314_v35 = vmul.f32 %v866_v31, %v309_v32 }
  0xe3   : > { %v302_v29 = vsub.f32 1.5, %v301_v27 }
  0xe5   : > { %v303_v30 = vmul.f32 %v872_v23, %v302_v29 }
  0xe7   : > { %v307_v33 = vsel %vm306_vm6, %v872_v23, %v303_v30 }
  0xe8   : > { %v310_v34 = vmul.f32 %v709_v3, %v307_v33 }
  0xea   : > { %v315_v36 = vmul.f32 %v866_v31, %v310_v34 }
  0xec   : > { %v713_v37 = vpack.c.bf16 %v315_v36, %v314_v35 }
  0xee   : > { %714 = vst [vmem:[#allocation2] sm:$0xff] %v713_v37  }
  0xef PF: > { %v673_v38 = vld [vmem:[%s1361_s3 + $0x70] sm:$0xf]  ;;  %v704_v39 = vld [vmem:[%s1361_s3 + $0x74] sm:$0xf0]  ;;  %v703_v40 = vld [vmem:[%s1361_s3 + $0x74] sm:$0xf] }
  0xf0   : > { %v674_v41 = vor.u32 %v704_v39, %v673_v38  ;;  %v675_v42 = vld [vmem:[%s1361_s3 + $0x78] sm:$0xf0]  ;;  %v665_v43 = vld [vmem:[%s1361_s3 + $0x60] sm:$0xf]  ;;  %v702_v44 = vld [vmem:[%s1361_s3 + $0x64] sm:$0xf0] }
  0xf1   : > { %v678_v45 = vor.u32 %v703_v40, %v675_v42  ;;  %v701_v46 = vld [vmem:[%s1361_s3 + $0x64] sm:$0xf]  ;;  %v667_v47 = vld [vmem:[%s1361_s3 + $0x68] sm:$0xf0]  ;;  %v666_v48 = vor.u32 %v702_v44, %v665_v43  ;;  %v657_v50 = vld [vmem:[%s1361_s3 + $0x50] sm:$0xf] }
  0xf2   : > { %424 = vmatpush.bf16.msra.mxu0 %v674_v41  ;;  %v670_v49 = vor.u32 %v701_v46, %v667_v47  ;;  %v700_v51 = vld [vmem:[%s1361_s3 + $0x54] sm:$0xf0]  ;;  %v699_v52 = vld [vmem:[%s1361_s3 + $0x54] sm:$0xf]  ;;  %v659_v53 = vld [vmem:[%s1361_s3 + $0x58] sm:$0xf0] }
  0xf3   : > { %438 = vmatpush.bf16.msra.mxu1 %v678_v45  ;;  %v658_v54 = vor.u32 %v700_v51, %v657_v50  ;;  %v662_v55 = vor.u32 %v699_v52, %v659_v53  ;;  %v649_v56 = vld [vmem:[%s1361_s3 + $0x40] sm:$0xf]  ;;  %v698_v57 = vld [vmem:[%s1361_s3 + $0x44] sm:$0xf0]  ;;  %v697_v58 = vld [vmem:[%s1361_s3 + $0x44] sm:$0xf] }
  0xf4   : > { %v651_v59 = vld [vmem:[%s1361_s3 + $0x48] sm:$0xf0]  ;;  %v650_v60 = vor.u32 %v698_v57, %v649_v56  ;;  %v641_v62 = vld [vmem:[%s1361_s3 + $0x30] sm:$0xf]  ;;  %v696_v63 = vld [vmem:[%s1361_s3 + $0x34] sm:$0xf0] }
  0xf5   : > { %v654_v61 = vor.u32 %v697_v58, %v651_v59  ;;  %v695_v0 = vld [vmem:[%s1361_s3 + $0x34] sm:$0xf]  ;;  %v643_v1 = vld [vmem:[%s1361_s3 + $0x38] sm:$0xf0]  ;;  %v642_v2 = vor.u32 %v696_v63, %v641_v62  ;;  %v633_v4 = vld [vmem:[%s1361_s3 + $0x20] sm:$0xf] }
  0xf6   : > { %425 = vmatpush.bf16.msra.mxu0 %v666_v48  ;;  %v646_v3 = vor.u32 %v695_v0, %v643_v1  ;;  %v694_v5 = vld [vmem:[%s1361_s3 + $0x24] sm:$0xf0]  ;;  %v693_v6 = vld [vmem:[%s1361_s3 + $0x24] sm:$0xf]  ;;  %v635_v7 = vld [vmem:[%s1361_s3 + $0x28] sm:$0xf0] }
  0xf7   : > { %439 = vmatpush.bf16.msra.mxu1 %v670_v49  ;;  %v634_v8 = vor.u32 %v694_v5, %v633_v4  ;;  %v638_v9 = vor.u32 %v693_v6, %v635_v7  ;;  %v625_v10 = vld [vmem:[%s1361_s3 + $0x10] sm:$0xf]  ;;  %v692_v11 = vld [vmem:[%s1361_s3 + $0x14] sm:$0xf0]  ;;  %v691_v12 = vld [vmem:[%s1361_s3 + $0x14] sm:$0xf] }
  0xf8   : > { %v627_v13 = vld [vmem:[%s1361_s3 + $0x18] sm:$0xf0]  ;;  %v626_v14 = vor.u32 %v692_v11, %v625_v10  ;;  %s1512_s27 = sld [smem:[#allocation16_spill]]  ;;  %v617_v16 = vld [vmem:[%s1361_s3] sm:$0xf]  ;;  %v688_v22 = vld [vmem:[#allocation2] sm:$0xff] }
  0xf9   : > { %v630_v15 = vor.u32 %v691_v12, %v627_v13  ;;  %v690_v17 = vld [vmem:[%s1361_s3 + $0x4] sm:$0xf0]  ;;  %v689_v18 = vld [vmem:[%s1361_s3 + $0x4] sm:$0xf]  ;;  %v619_v19 = vld [vmem:[%s1361_s3 + $0x8] sm:$0xf0] }
  0xfa   : > { %426 = vmatpush.bf16.msra.mxu0 %v658_v54  ;;  %v618_v20 = vor.u32 %v690_v17, %v617_v16  ;;  %v622_v21 = vor.u32 %v689_v18, %v619_v19  ;;  %s681_s18 = sshll.u32 %s1101_s21, 1  ;;  %s1513_s11 = sld [smem:[#allocation25_spill]] }
  0xfb   : > { %440 = vmatpush.bf16.msra.mxu1 %v662_v55  ;;  %s472_s0 = sshll.u32 %s1370_s30, 4  ;;  %s457_s21 = scalar_lea.sflag [#allocation5], %s256_s22  ;;  %s473_s0 = int_to_ptr.vmem [resolvable:$true] %s472_s0 }
  0xfe   : > { %427 = vmatpush.bf16.msra.mxu0 %v650_v60  ;;  %s705_s28 = sshll.u32 %s1512_s27, 3 }
  0xff   : > { %441 = vmatpush.bf16.msra.mxu1 %v654_v61  ;;  %s469_s29 = sadd.s32 %s705_s28, %s681_s18 }
 0x100   : > { %s683_s9 = sshll.u32 %s469_s29, 2  ;;  %s983_s20 = scalar_lea.hbm %s1513_s11, 64 }
 0x101   : > { %s471_s4 = scalar_lea.hbm %s1513_s11, %s683_s9 }
 0x102   : > { %428 = vmatpush.bf16.msra.mxu0 %v642_v2  ;;  %s474_s1 = sshll.u32 %s471_s4, 4  ;;  %s475_s1 = int_to_ptr.hbm [resolvable:$true] %s474_s1 }
 0x103   : > { %442 = vmatpush.bf16.msra.mxu1 %v646_v3  ;;  %s977_s24 = sshra.s32 %s475_s1, 4  ;;  %s978_s24 = int_to_ptr.hbm [resolvable:$true] %s977_s24 }
 0x104   : > { %s979_s10 = scalar_lea.hbm %s978_s24, 16  ;;  %p984_p9 = scmp.lt.s32.totalorder %s978_s24, %s1513_s11 }
 0x105   : > { %p980_p12 = scmp.ne.s32.totalorder %s978_s24, %s979_s10  ;;  %p985_p10 = scmp.lt.s32.totalorder %s983_s20, %s979_s10 }
 0x106   : > { %429 = vmatpush.bf16.msra.mxu0 %v634_v8 }
 0x107   : > { %443 = vmatpush.bf16.msra.mxu1 %v638_v9  ;;  %p981_p1 = pnand %p980_p12, %p1309_p7  ;;  %p986_p13 = por %p985_p10, %p984_p9 }
 0x109   : > { %p982_p4 = pneg %p981_p1 }
 0x10a   : > { %430 = vmatpush.bf16.msra.mxu0 %v626_v14 }
 0x10b   : > { %444 = vmatpush.bf16.msra.mxu1 %v630_v15  ;;  %p987_p8 = pnand %p986_p13, %p982_p4 }
 0x10e   : > { %431 = vmatpush.bf16.msra.mxu0 %v618_v20 }
 0x10f   : > { %445 = vmatpush.bf16.msra.mxu1 %v622_v21 }
 0x111   : > { %432 = vmatmul.bf16.vlgmr.msra.gmra.mxu0 %v688_v22 }
 0x112   : > { %446 = vmatmul.bf16.vlgmr.msra.gmra.mxu1 %v688_v22 }
 0x18e   : > { %v433_v23 = vpop.f32.mrf.mxu0 }
 0x18f   : > { %v447_v24 = vpop.f32.mrf.mxu1 }
 0x190   : > { %v452_v25 = vpack.c.bf16 %v447_v24, %v433_v23 }
 0x192   : > { %454 = vst [vmem:[%s1370_s30] sm:$0xff] %v452_v25 }
 0x196   : > { %v435_v26 = vpop.f32.mrf.mxu0 }
 0x197   : > { %v449_v27 = vpop.f32.mrf.mxu1 }
 0x198   : > { %v453_v28 = vpack.c.bf16 %v449_v27, %v435_v26 }
 0x19a   : > { %455 = vst [vmem:[%s1370_s30 + $0x8] sm:$0xff] %v453_v28 }
 0x19b   : > { %990 = shalt.err (!%p987_p8)
}
 0x19c   : > { %s1126_s22 = smov 128   ;;  %s1127_s30 = smov 256  }
 0x19d   : > { %s1128_s27 = smov 8  }
 0x19e   : > { %723 = dma.vmem_to_hbm [thread:$0]  (%p1309_p7), %s473_s0, 256, %s475_s1, %s457_s21, %s1126_s22, %s1127_s30, %s1128_s27  }
 0x19f PF: > { %p743_p0 = scmp.ge.s32.totalorder %s1117_s25, 2  ;;  %s489_s18 = sand.u32 1, %s1065_s12  }
 0x1a0   : > { %s490_s28 = scalar_lea.sflag [#allocation5], %s489_s18 }
 0x1a1   : > { %p737_p3 = pnand %p743_p0, %p1317_p6 }
 0x1a3   : > { %p738_p5 = pneg %p737_p3 }
 0x1a5   : > { %1060 = dma.done.wait (%p738_p5), %s490_s28, 256  }
 0x1a6   : > { %1062 = vsyncadd (%p738_p5), %s490_s28, 4294967040  ;;  %s20_s25 = sadd.s32 1, %s1117_s25   ;;  %s1515_s15 = sld [smem:[#allocation14_spill]] }
 0x1a7   : > { %p1430_p2 = scmp.ge.s32.totalorder %s20_s25, 6   ;;  %s1516_s14 = sld [smem:[#allocation22_spill]] }
 0x1a8   : > { %s1517_s9 = sld [smem:[#allocation21_spill]]  ;;  %s1523_s12 = smov %s1069_s13 }
 0x1a9   : > { %s1518_s7 = sld [smem:[#allocation15_spill]]  ;;  %s1528_s18 = smov %s1093_s19 }
 0x1aa   : > { %s1519_s20 = sld [smem:[#allocation20_spill]]  ;;  %s1530_s21 = smov %s1109_s23 }
 0x1ab   : > { %s1520_s22 = sld [smem:[#allocation17_spill]] }
 0x1ac   : > { %s1521_s6 = sld [smem:[#allocation18_spill]]  ;;  %s1524_s13 = smov %s1515_s15 }
 0x1ad   : > { %s1522_s24 = sld [smem:[#allocation19_spill]]  ;;  %s1525_s15 = smov %s1081_s16 }
 0x1ae   : > { %s1526_s16 = smov %s1085_s17  ;;  %s1527_s17 = smov %s1517_s9 }
 0x1af   : > { %s1529_s19 = smov %s1518_s7  ;;  %19 = sbr.rel (!%p1430_p2) target bundleno = 15 (0xf), region = 97 }
 0x1b2   : > { %s1531_s23 = smov %s1521_s6 }
 0x1b4   :  { %496 = vsyncpa [#allocation4], 1 }
 0x1b5   :  { %498 = vsyncpa [#allocation4 + $0x1], 1 }
 0x1b6   :  { %499 = vsyncpa [#allocation7], 1 }
 0x1b7   :  { %501 = vsyncpa [#allocation7 + $0x1], 1 }
 0x1b8   :  { %502 = vsyncpa [#allocation5], 1 }
 0x1b9   :  { %504 = vsyncpa [#allocation5 + $0x1], 1 }

</bundles_post_ra>
